<compile_context>
chip_gen: v5e
topology: v5e:2x2
jax: 0.10.0
libtpu: 0.0.40
codegen_flags: <defaults>
</compile_context>

<pallas_src>
import functools
import math

import jax
import jax.numpy as jnp
from jax.experimental import pallas as pl
from jax.experimental.pallas import tpu as pltpu

EVAL_CAPACITY_TOKEN_FRACTION = 0.25
SAMPLE_FRACTION = 0.2
NEG_INF = -1e9  # matches masked_fill(-1000000000.0) in the reference


def _htop1_gate_kernel(x1_ref, x2_ref, w1_ref, w2_ref,
                       combine_ref, fidx_ref, gval_ref,
                       counts_ref, laux_ref, ent_ref,
                       tri_ref, stats_ref, ent_acc_ref,
                       *, capacity, k, num_tokens, padded_tokens, matmul_dtype):
    t = pl.program_id(0)
    nt = pl.num_programs(0)
    TS, D = x1_ref.shape
    E = w1_ref.shape[1]
    EC = combine_ref.shape[1]          # E * capacity (flattened combine row)
    f32 = jnp.float32

    @pl.when(t == 0)
    def _init():
        stats_ref[...] = jnp.zeros_like(stats_ref)
        ent_acc_ref[...] = jnp.zeros_like(ent_acc_ref)
        # Lower-triangular (inclusive) 0/1 matrix for the within-tile cumsum,
        # built once and reused by every tile.
        r_iota = jax.lax.broadcasted_iota(jnp.int32, (TS, TS), 0)
        c_iota = jax.lax.broadcasted_iota(jnp.int32, (TS, TS), 1)
        tri_ref[...] = (c_iota <= r_iota).astype(tri_ref.dtype)

    e_iota = jax.lax.broadcasted_iota(jnp.int32, (TS, E), 1)

    # ---- first-level (group) gate: wg1 logits, expert-0 (common MLP) masked ----
    gl = jnp.dot(x1_ref[...].astype(matmul_dtype),
                 w1_ref[...].astype(matmul_dtype),
                 preferred_element_type=f32)                        # [TS, E]
    gl = jnp.where(e_iota == 0, NEG_INF, gl)
    # NOTE: the reference softmaxes these logits before topk; softmax is strictly
    # monotone per row, so top-k on the masked logits selects the same experts
    # and an exp/sum/div pass over [TS, E] is skipped.

    # ---- top-k (k = E//4) multi-hot group mask ---------------------------------
    # TODO(synk): `one_hot_group_mask` is undefined in the reference source;
    # implemented as the multi-hot scatter of the top-k group indices
    # (first-index tie-break, matching torch.topk).
    remaining = gl
    group_mask = jnp.zeros((TS, E), jnp.bool_)
    for _ in range(k):  # k is a small static Python int
        mval = jnp.max(remaining, axis=1, keepdims=True)
        first = jnp.min(jnp.where(remaining == mval, e_iota, E),
                        axis=1, keepdims=True)
        sel = e_iota == first
        group_mask = group_mask | sel
        remaining = jnp.where(sel, -1e30, remaining)

    # ---- second-level gate: wg2 logits, softmax restricted to selected group ---
    l2 = jnp.dot(x2_ref[...].astype(matmul_dtype),
                 w2_ref[...].astype(matmul_dtype),
                 preferred_element_type=f32)                        # [TS, E]
    l2m = jnp.where(group_mask, l2, NEG_INF)
    l2m = l2m - jnp.max(l2m, axis=1, keepdims=True)
    e2 = jnp.exp(l2m)
    gates = e2 / jnp.sum(e2, axis=1, keepdims=True)                 # [TS, E] f32

    # validity mask for padded tokens (static no-op when S % TS == 0)
    if padded_tokens > num_tokens:
        tok = t * TS + jax.lax.broadcasted_iota(jnp.int32, (TS, 1), 0)
        valid = (tok < num_tokens).astype(f32)                      # [TS, 1]
    else:
        valid = None

    # ---- entropy(gates) running sum (metadata) ----------------------------------
    plogp = gates * jnp.log(jnp.where(gates > 0.0, gates, 1.0))     # 0 where p == 0
    ent_row = -jnp.sum(plogp, axis=1, keepdims=True)                # [TS, 1]
    if valid is not None:
        ent_row = ent_row * valid
    ent_acc_ref[...] += jnp.sum(ent_row, axis=0, keepdims=True)     # [1, 1]

    # ---- top-1 routing -----------------------------------------------------------
    gmax = jnp.max(gates, axis=1, keepdims=True)
    first1 = jnp.min(jnp.where(gates == gmax, e_iota, E),
                     axis=1, keepdims=True)                         # [TS, 1] argmax
    mask1 = (e_iota == first1).astype(f32)                          # one-hot
    if valid is not None:
        mask1 = mask1 * valid
        gates1_s = gmax * valid                                     # = sum(gates*mask1)
    else:
        gates1_s = gmax

    # ---- token positions: per-tile triangular cumsum + cross-tile carry ---------
    prev_counts = stats_ref[0:1, :]                                 # [1, E]
    prev_gsum = stats_ref[1:2, :]                                   # [1, E]
    tile_cumsum = jnp.dot(tri_ref[...], mask1.astype(tri_ref.dtype),
                          preferred_element_type=f32)               # [TS, E]
    locations1 = tile_cumsum + prev_counts - 1.0                    # global cumsum - 1

    # running accumulators for me / ce (l_aux), histogram counts, cumsum carry
    gates_for_me = gates if valid is None else gates * valid
    new_counts = prev_counts + jnp.sum(mask1, axis=0, keepdims=True)
    new_gsum = prev_gsum + jnp.sum(gates_for_me, axis=0, keepdims=True)
    stats_ref[0:1, :] = new_counts
    stats_ref[1:2, :] = new_gsum

    # ---- capacity drop + compact per-token routing outputs -----------------------
    loc_f = jnp.sum(locations1 * mask1, axis=1, keepdims=True)      # position at chosen expert
    keep = (loc_f < float(capacity)).astype(f32)                    # [TS, 1] 0/1
    gate_val = gates1_s * keep                                      # 0 for dropped/padded tokens
    loc_int = loc_f.astype(jnp.int32)
    # flat one-hot index into the [E, C] plane; may exceed E*C only when gate_val == 0,
    # in which case the whole row is zero anyway (matches reference semantics).
    flat_idx = first1 * capacity + loc_int                          # [TS, 1] int32

    fidx_ref[...] = flat_idx
    gval_ref[...] = gate_val

    # combine[s, e*C + c] = gate_val[s] at flat index, else 0 (lane-dense store).
    j_iota = jax.lax.broadcasted_iota(jnp.int32, (TS, EC), 1)
    flat_b = jax.lax.broadcast_in_dim(flat_idx, (TS, EC), (0, 1))
    gate_b = jax.lax.broadcast_in_dim(gate_val.astype(combine_ref.dtype),
                                      (TS, EC), (0, 1))
    combine_ref[...] = jnp.where(j_iota == flat_b, gate_b,
                                 jnp.zeros((), combine_ref.dtype))

    @pl.when(t == nt - 1)
    def _finalize():
        inv_s = 1.0 / float(num_tokens)
        me = new_gsum * inv_s
        ce = new_counts * inv_s
        counts_ref[...] = new_counts                                 # argmax histogram
        # l_aux = sum(me*ce) / (E//4) * E * E   (as in the reference)
        laux_ref[...] = (jnp.sum(me * ce, axis=1, keepdims=True)
                         * (float(E) * float(E) / float(k)))
        ent_ref[...] = ent_acc_ref[...] * inv_s                      # mean entropy


def _pick_token_tile(num_tokens, model_dim, num_experts, capacity,
                     in_itemsize, out_itemsize):
    """Largest multiple-of-8 token tile whose combine block + temps fit ~8 MiB."""
    ec = num_experts * capacity
    heavy_per_token = (2 * ec * out_itemsize          # double-buffered combine block
                       + 4 * ec * 4                   # iota / compare / select temps
                       + 4 * model_dim * in_itemsize  # x1, x2 (double-buffered)
                       + 16 * max(num_experts, 128) * 4
                       + 64)
    ts = (8 * 1024 * 1024) // heavy_per_token
    ts = max(8, min(512, (ts // 8) * 8))              # 512 cap also bounds [TS,TS] tri
    ts = max(8, min(ts, ((num_tokens + 7) // 8) * 8))
    for cand in range(ts, 7, -8):                     # prefer a divisor of S (no padding)
        if num_tokens % cand == 0:
            return cand
    return ts                                          # no divisor found: pad token axis


def htop1_gate_forward(input1, input2, wg1, wg2, *,
                       capacity_factor=1.0,
                       eval_mode=False,
                       moe_eval_capacity_token_fraction=EVAL_CAPACITY_TOKEN_FRACTION,
                       matmul_dtype=jnp.bfloat16,
                       out_dtype=None):
    """Matches HTop1Gate.forward(input1, input2) (mask=None, training mode)."""
    S, D = input1.shape
    E = wg1.shape[1]
    k = E // 4
    if moe_eval_capacity_token_fraction > 0.0 and eval_mode:
        capacity = int(math.ceil(moe_eval_capacity_token_fraction * S))
    else:
        capacity = int(2 * math.ceil(S / k) * capacity_factor)
    C = capacity
    EC = E * C
    out_dtype = jnp.dtype(out_dtype) if out_dtype is not None else jnp.dtype(input2.dtype)

    in_b = jnp.dtype(input1.dtype).itemsize
    w_b = jnp.dtype(wg1.dtype).itemsize
    o_b = out_dtype.itemsize

    TS = _pick_token_tile(S, D, E, C, in_b, o_b)
    S_pad = ((S + TS - 1) // TS) * TS
    if S_pad != S:
        in1 = jnp.pad(input1, ((0, S_pad - S), (0, 0)))
        in2 = jnp.pad(input2, ((0, S_pad - S), (0, 0)))
    else:
        in1, in2 = input1, input2
    num_tiles = S_pad // TS

    kernel = functools.partial(
        _htop1_gate_kernel, capacity=C, k=k, num_tokens=S, padded_tokens=S_pad,
        matmul_dtype=matmul_dtype)

    E_l = max(E, 128)
    EC_l = max(EC, 128)
    vmem_est = (2 * 2 * TS * D * in_b            # x1, x2 (double-buffered)
                + 2 * 2 * D * E_l * w_b          # wg1, wg2
                + 2 * TS * EC_l * o_b            # combine output block
                + 4 * 2 * TS * 128 * 4           # fidx / gval narrow outputs
                + TS * TS * 2 + TS * TS * 4      # tri scratch + cumsum matmul temp
                + 5 * TS * EC_l * 4              # flat one-hot temps
                + 24 * TS * E_l * 4              # [TS, E] gate temps
                + 8 * 8 * 128 * 4)               # small outputs + stats scratch
    vmem_limit = int(min(64 * 1024 * 1024,
                         max(32 * 1024 * 1024, int(vmem_est * 1.25))))

    cost = pl.CostEstimate(
        flops=2 * 2 * S_pad * D * E + 2 * S_pad * TS * E + S_pad * EC,
        transcendentals=2 * S_pad * E,
        bytes_accessed=(2 * S_pad * D * in_b + 2 * D * E * w_b
                        + S_pad * EC * o_b + 2 * S_pad * 4 + E * 4 + 8),
    )

    combine_flat, fidx, gval, counts, laux, ent = pl.pallas_call(
        kernel,
        out_shape=(
            jax.ShapeDtypeStruct((S_pad, EC), out_dtype),
            jax.ShapeDtypeStruct((S_pad, 1), jnp.int32),
            jax.ShapeDtypeStruct((S_pad, 1), jnp.float32),
            jax.ShapeDtypeStruct((1, E), jnp.float32),
            jax.ShapeDtypeStruct((1, 1), jnp.float32),
            jax.ShapeDtypeStruct((1, 1), jnp.float32),
        ),
        grid=(num_tiles,),
        in_specs=[
            pl.BlockSpec((TS, D), lambda i: (i, 0)),
            pl.BlockSpec((TS, D), lambda i: (i, 0)),
            pl.BlockSpec((D, E), lambda i: (0, 0)),
            pl.BlockSpec((D, E), lambda i: (0, 0)),
        ],
        out_specs=(
            pl.BlockSpec((TS, EC), lambda i: (i, 0)),
            pl.BlockSpec((TS, 1), lambda i: (i, 0)),
            pl.BlockSpec((TS, 1), lambda i: (i, 0)),
            pl.BlockSpec((1, E), lambda i: (0, 0)),
            pl.BlockSpec((1, 1), lambda i: (0, 0)),
            pl.BlockSpec((1, 1), lambda i: (0, 0)),
        ),
        scratch_shapes=[
            pltpu.VMEM((TS, TS), jnp.bfloat16),   # lower-triangular cumsum matrix
            pltpu.VMEM((2, E), jnp.float32),      # [counts; gate sums] carry
            pltpu.VMEM((1, 1), jnp.float32),      # entropy accumulator
        ],
        compiler_params=pltpu.CompilerParams(
            dimension_semantics=("arbitrary",),   # serial: cumsum / l_aux carry
            vmem_limit_bytes=vmem_limit),
        cost_estimate=cost,
    )(in1, in2, wg1, wg2)

    if S_pad != S:
        combine_flat, fidx, gval = combine_flat[:S], fidx[:S], gval[:S]

    l_aux = laux[0, 0]
    combine_weights = combine_flat.reshape(S, E, C)   # row-major: j = e*C + c (free)

    # dispatch_mask == (combine != 0), rebuilt from the compact per-token routing
    # outputs so the dense [S, E, C] tensor is never re-read from HBM.
    j_ar = jnp.arange(EC, dtype=jnp.int32)[None, :]
    dispatch_mask = ((fidx == j_ar) & (gval != 0.0)).reshape(S, E, C)

    # ---- metadata (scalars / [E]-sized, from kernel reductions) ------------------
    tiny = jnp.finfo(jnp.float32).tiny
    expert1_hist = 100.0 * counts[0] / S
    unused_expert1_count = jnp.sum(expert1_hist == 0)
    hist_sorted = jnp.sort(expert1_hist)[::-1] + tiny
    sample_count = max(math.ceil(E * SAMPLE_FRACTION), 1)
    metadata = {
        "entropy_gating": ent[0, 0],
        "unused_expert1_count": unused_expert1_count,
        "expert1_balance_top": jnp.sum(hist_sorted[:sample_count]),
        "expert1_balance_bottom": jnp.sum(hist_sorted[-sample_count:]),
    }
    # TODO(synk): padding `mask` and batch_prioritized_routing=True paths are not
    # implemented (reference defaults: mask=None, batch_prioritized_routing=False).
    return l_aux, combine_weights, dispatch_mask, metadata


if __name__ == "__main__":
    # Small shapes implied by the module: S tokens, model_dim D, E experts.
    S, D, E = 8, 32, 8          # expert_group_size = E // 4 = 2, capacity = 8

    key = jax.random.PRNGKey(0)
    k1, k2, k3, k4 = jax.random.split(key, 4)
    # torch Linear weight is [E, D]; stored here transposed as [D, E].
    wg1 = jax.random.normal(k1, (D, E), jnp.float32) / math.sqrt(D)
    wg2 = jax.random.normal(k2, (D, E), jnp.float32) / math.sqrt(D)
    input1 = jax.random.normal(k3, (S, D), jnp.float32)
    input2 = jax.random.normal(k4, (S, D), jnp.float32)

    l_aux, combine_weights, dispatch_mask, metadata = htop1_gate_forward(
        input1, input2, wg1, wg2)
    jax.block_until_ready((l_aux, combine_weights, dispatch_mask,
                           metadata["entropy_gating"]))
    print("KERNEL_OK")
</pallas_src>

<mosaic_0001>
module attributes {stable_mosaic.version = 11 : i64} {
  func.func @_htop1_gate_kernel(%arg0: i32, %arg1: memref<8x32xf32, #tpu.memory_space<vmem>>, %arg2: memref<8x32xf32, #tpu.memory_space<vmem>>, %arg3: memref<32x8xf32, #tpu.memory_space<vmem>>, %arg4: memref<32x8xf32, #tpu.memory_space<vmem>>, %arg5: memref<8x64xf32, #tpu.memory_space<vmem>>, %arg6: memref<8x1xi32, #tpu.memory_space<vmem>>, %arg7: memref<8x1xf32, #tpu.memory_space<vmem>>, %arg8: memref<1x8xf32, #tpu.memory_space<vmem>>, %arg9: memref<1x1xf32, #tpu.memory_space<vmem>>, %arg10: memref<1x1xf32, #tpu.memory_space<vmem>>, %arg11: memref<8x8xbf16, #tpu.memory_space<vmem>>, %arg12: memref<2x8xf32, #tpu.memory_space<vmem>>, %arg13: memref<1x1xf32, #tpu.memory_space<vmem>>) attributes {dimension_semantics = [#tpu.dimension_semantics<arbitrary>], iteration_bounds = array<i64: 1>, scalar_prefetch = 0 : i64, scratch_operands = 3 : i64, tpu.core_type = #tpu.core_type<tc>, window_params = [{transform_indices = @transform_0, window_bounds = array<i64: 8, 32>}, {transform_indices = @transform_1, window_bounds = array<i64: 8, 32>}, {pipeline_mode = #tpu.pipeline_mode<synchronous>, transform_indices = @transform_2, window_bounds = array<i64: 32, 8>}, {pipeline_mode = #tpu.pipeline_mode<synchronous>, transform_indices = @transform_3, window_bounds = array<i64: 32, 8>}, {transform_indices = @transform_4, window_bounds = array<i64: 8, 64>}, {transform_indices = @transform_5, window_bounds = array<i64: 8, 1>}, {transform_indices = @transform_6, window_bounds = array<i64: 8, 1>}, {pipeline_mode = #tpu.pipeline_mode<synchronous>, transform_indices = @transform_7, window_bounds = array<i64: 1, 8>}, {pipeline_mode = #tpu.pipeline_mode<synchronous>, transform_indices = @transform_8, window_bounds = array<i64: 1, 1>}, {pipeline_mode = #tpu.pipeline_mode<synchronous>, transform_indices = @transform_9, window_bounds = array<i64: 1, 1>}]} {
    %c0_i32 = arith.constant 0 : i32
    %0 = arith.cmpi eq, %arg0, %c0_i32 : i32
    %1 = arith.extui %0 : i1 to i32
    %c0_i32_0 = arith.constant 0 : i32
    %2 = arith.cmpi ne, %1, %c0_i32_0 : i32
    scf.if %2 {
      %cst_57 = arith.constant 0.000000e+00 : f32
      %124 = vector.broadcast %cst_57 : f32 to vector<2x8xf32>
      %c0_58 = arith.constant 0 : index
      %c0_59 = arith.constant 0 : index
      %125 = vector.load %arg12[%c0_58, %c0_59] : memref<2x8xf32, #tpu.memory_space<vmem>>, vector<2x8xf32>
      tpu.vector_store %arg12[%c0_58, %c0_59], %124 {strides = array<i32>} : memref<2x8xf32, #tpu.memory_space<vmem>>, vector<2x8xf32>,
      %cst_60 = arith.constant 0.000000e+00 : f32
      %126 = vector.broadcast %cst_60 : f32 to vector<1x1xf32>
      %c0_61 = arith.constant 0 : index
      %c0_62 = arith.constant 0 : index
      %127 = vector.load %arg13[%c0_61, %c0_62] : memref<1x1xf32, #tpu.memory_space<vmem>>, vector<1x1xf32>
      tpu.vector_store %arg13[%c0_61, %c0_62], %126 {strides = array<i32>} : memref<1x1xf32, #tpu.memory_space<vmem>>, vector<1x1xf32>,
      %128 = tpu.iota {dimensions = array<i32: 0>} : vector<8x8xi32>
      %129 = tpu.iota {dimensions = array<i32: 1>} : vector<8x8xi32>
      %130 = arith.cmpi sle, %129, %128 : vector<8x8xi32>
      %131 = arith.extui %130 : vector<8x8xi1> to vector<8x8xi32>
      %132 = arith.sitofp %131 : vector<8x8xi32> to vector<8x8xf32>
      %133 = arith.truncf %132 : vector<8x8xf32> to vector<8x8xbf16>
      %c0_63 = arith.constant 0 : index
      %c0_64 = arith.constant 0 : index
      %134 = vector.load %arg11[%c0_63, %c0_64] : memref<8x8xbf16, #tpu.memory_space<vmem>>, vector<8x8xbf16>
      tpu.vector_store %arg11[%c0_63, %c0_64], %133 {strides = array<i32>} : memref<8x8xbf16, #tpu.memory_space<vmem>>, vector<8x8xbf16>,
    } else {
    }
    %3 = tpu.iota {dimensions = array<i32: 1>} : vector<8x8xi32>
    %c0 = arith.constant 0 : index
    %c0_1 = arith.constant 0 : index
    %4 = vector.load %arg1[%c0, %c0_1] : memref<8x32xf32, #tpu.memory_space<vmem>>, vector<8x32xf32>
    %5 = arith.truncf %4 : vector<8x32xf32> to vector<8x32xbf16>
    %c0_2 = arith.constant 0 : index
    %c0_3 = arith.constant 0 : index
    %6 = vector.load %arg3[%c0_2, %c0_3] : memref<32x8xf32, #tpu.memory_space<vmem>>, vector<32x8xf32>
    %7 = arith.truncf %6 : vector<32x8xf32> to vector<32x8xbf16>
    %cst = arith.constant dense<0.000000e+00> : vector<8x8xf32>
    %8 = tpu.matmul %5, %7, %cst {dimension_numbers = #tpu.dot_dimension_numbers<[1], [0], [0], [1], [0, 0, 1, 1], [], []>} : vector<8x32xbf16>, vector<32x8xbf16>, vector<8x8xf32> -> vector<8x8xf32>
    %c0_i32_4 = arith.constant 0 : i32
    %9 = vector.broadcast %c0_i32_4 : i32 to vector<8x8xi32>
    %10 = arith.cmpi eq, %3, %9 : vector<8x8xi32>
    %cst_5 = arith.constant -1.000000e+09 : f32
    %11 = vector.broadcast %cst_5 : f32 to vector<8x8xf32>
    %12 = arith.select %10, %11, %8 : vector<8x8xi1>, vector<8x8xf32>
    %false = arith.constant false
    %13 = vector.broadcast %false : i1 to vector<8x8xi1>
    %cst_6 = arith.constant dense<0xFF800000> : vector<8xf32>
    %14 = vector.multi_reduction <maximumf>, %12, %cst_6 [1] : vector<8x8xf32> to vector<8xf32>
    %15 = vector.shape_cast %14 : vector<8xf32> to vector<8x1xf32>
    %16 = vector.broadcast %15 : vector<8x1xf32> to vector<8x8xf32>
    %17 = arith.cmpf oeq, %12, %16 : vector<8x8xf32>
    %c8_i32 = arith.constant 8 : i32
    %18 = vector.broadcast %c8_i32 : i32 to vector<8x8xi32>
    %19 = arith.select %17, %3, %18 : vector<8x8xi1>, vector<8x8xi32>
    %cst_7 = arith.constant dense<2147483647> : vector<8xi32>
    %20 = vector.multi_reduction <minsi>, %19, %cst_7 [1] : vector<8x8xi32> to vector<8xi32>
    %21 = vector.shape_cast %20 : vector<8xi32> to vector<8x1xi32>
    %22 = vector.broadcast %21 : vector<8x1xi32> to vector<8x8xi32>
    %23 = arith.cmpi eq, %3, %22 : vector<8x8xi32>
    %24 = arith.ori %13, %23 : vector<8x8xi1>
    %cst_8 = arith.constant -1.000000e+30 : f32
    %25 = vector.broadcast %cst_8 : f32 to vector<8x8xf32>
    %26 = arith.select %23, %25, %12 : vector<8x8xi1>, vector<8x8xf32>
    %cst_9 = arith.constant dense<0xFF800000> : vector<8xf32>
    %27 = vector.multi_reduction <maximumf>, %26, %cst_9 [1] : vector<8x8xf32> to vector<8xf32>
    %28 = vector.shape_cast %27 : vector<8xf32> to vector<8x1xf32>
    %29 = vector.broadcast %28 : vector<8x1xf32> to vector<8x8xf32>
    %30 = arith.cmpf oeq, %26, %29 : vector<8x8xf32>
    %c8_i32_10 = arith.constant 8 : i32
    %31 = vector.broadcast %c8_i32_10 : i32 to vector<8x8xi32>
    %32 = arith.select %30, %3, %31 : vector<8x8xi1>, vector<8x8xi32>
    %cst_11 = arith.constant dense<2147483647> : vector<8xi32>
    %33 = vector.multi_reduction <minsi>, %32, %cst_11 [1] : vector<8x8xi32> to vector<8xi32>
    %34 = vector.shape_cast %33 : vector<8xi32> to vector<8x1xi32>
    %35 = vector.broadcast %34 : vector<8x1xi32> to vector<8x8xi32>
    %36 = arith.cmpi eq, %3, %35 : vector<8x8xi32>
    %37 = arith.ori %24, %36 : vector<8x8xi1>
    %c0_12 = arith.constant 0 : index
    %c0_13 = arith.constant 0 : index
    %38 = vector.load %arg2[%c0_12, %c0_13] : memref<8x32xf32, #tpu.memory_space<vmem>>, vector<8x32xf32>
    %39 = arith.truncf %38 : vector<8x32xf32> to vector<8x32xbf16>
    %c0_14 = arith.constant 0 : index
    %c0_15 = arith.constant 0 : index
    %40 = vector.load %arg4[%c0_14, %c0_15] : memref<32x8xf32, #tpu.memory_space<vmem>>, vector<32x8xf32>
    %41 = arith.truncf %40 : vector<32x8xf32> to vector<32x8xbf16>
    %cst_16 = arith.constant dense<0.000000e+00> : vector<8x8xf32>
    %42 = tpu.matmul %39, %41, %cst_16 {dimension_numbers = #tpu.dot_dimension_numbers<[1], [0], [0], [1], [0, 0, 1, 1], [], []>} : vector<8x32xbf16>, vector<32x8xbf16>, vector<8x8xf32> -> vector<8x8xf32>
    %cst_17 = arith.constant -1.000000e+09 : f32
    %43 = vector.broadcast %cst_17 : f32 to vector<8x8xf32>
    %44 = arith.select %37, %42, %43 : vector<8x8xi1>, vector<8x8xf32>
    %cst_18 = arith.constant dense<0xFF800000> : vector<8xf32>
    %45 = vector.multi_reduction <maximumf>, %44, %cst_18 [1] : vector<8x8xf32> to vector<8xf32>
    %46 = vector.shape_cast %45 : vector<8xf32> to vector<8x1xf32>
    %47 = vector.broadcast %46 : vector<8x1xf32> to vector<8x8xf32>
    %48 = arith.subf %44, %47 : vector<8x8xf32>
    %49 = math.exp %48 : vector<8x8xf32>
    %cst_19 = arith.constant dense<0.000000e+00> : vector<8xf32>
    %50 = vector.multi_reduction <add>, %49, %cst_19 [1] : vector<8x8xf32> to vector<8xf32>
    %51 = vector.shape_cast %50 : vector<8xf32> to vector<8x1xf32>
    %52 = vector.broadcast %51 : vector<8x1xf32> to vector<8x8xf32>
    %53 = arith.divf %49, %52 : vector<8x8xf32>
    %cst_20 = arith.constant 0.000000e+00 : f32
    %54 = vector.broadcast %cst_20 : f32 to vector<8x8xf32>
    %55 = arith.cmpf ogt, %53, %54 : vector<8x8xf32>
    %cst_21 = arith.constant 1.000000e+00 : f32
    %56 = vector.broadcast %cst_21 : f32 to vector<8x8xf32>
    %57 = arith.select %55, %53, %56 : vector<8x8xi1>, vector<8x8xf32>
    %58 = math.log %57 : vector<8x8xf32>
    %59 = arith.mulf %53, %58 : vector<8x8xf32>
    %cst_22 = arith.constant dense<0.000000e+00> : vector<8xf32>
    %60 = vector.multi_reduction <add>, %59, %cst_22 [1] : vector<8x8xf32> to vector<8xf32>
    %61 = vector.shape_cast %60 : vector<8xf32> to vector<8x1xf32>
    %cst_23 = arith.constant 0.000000e+00 : f32
    %62 = vector.broadcast %cst_23 : f32 to vector<8x1xf32>
    %63 = arith.subf %62, %61 : vector<8x1xf32>
    %c0_24 = arith.constant 0 : index
    %c0_25 = arith.constant 0 : index
    %64 = vector.load %arg13[%c0_24, %c0_25] : memref<1x1xf32, #tpu.memory_space<vmem>>, vector<1x1xf32>
    %cst_26 = arith.constant dense<0.000000e+00> : vector<1xf32>
    %65 = vector.multi_reduction <add>, %63, %cst_26 [0] : vector<8x1xf32> to vector<1xf32>
    %66 = vector.shape_cast %65 : vector<1xf32> to vector<1x1xf32>
    %67 = arith.addf %64, %66 : vector<1x1xf32>
    %c0_27 = arith.constant 0 : index
    %c0_28 = arith.constant 0 : index
    %68 = vector.load %arg13[%c0_27, %c0_28] : memref<1x1xf32, #tpu.memory_space<vmem>>, vector<1x1xf32>
    tpu.vector_store %arg13[%c0_27, %c0_28], %67 {strides = array<i32>} : memref<1x1xf32, #tpu.memory_space<vmem>>, vector<1x1xf32>,
    %cst_29 = arith.constant dense<0xFF800000> : vector<8xf32>
    %69 = vector.multi_reduction <maximumf>, %53, %cst_29 [1] : vector<8x8xf32> to vector<8xf32>
    %70 = vector.shape_cast %69 : vector<8xf32> to vector<8x1xf32>
    %71 = vector.broadcast %70 : vector<8x1xf32> to vector<8x8xf32>
    %72 = arith.cmpf oeq, %53, %71 : vector<8x8xf32>
    %c8_i32_30 = arith.constant 8 : i32
    %73 = vector.broadcast %c8_i32_30 : i32 to vector<8x8xi32>
    %74 = arith.select %72, %3, %73 : vector<8x8xi1>, vector<8x8xi32>
    %cst_31 = arith.constant dense<2147483647> : vector<8xi32>
    %75 = vector.multi_reduction <minsi>, %74, %cst_31 [1] : vector<8x8xi32> to vector<8xi32>
    %76 = vector.shape_cast %75 : vector<8xi32> to vector<8x1xi32>
    %77 = vector.broadcast %76 : vector<8x1xi32> to vector<8x8xi32>
    %78 = arith.cmpi eq, %3, %77 : vector<8x8xi32>
    %79 = arith.extui %78 : vector<8x8xi1> to vector<8x8xi32>
    %80 = arith.sitofp %79 : vector<8x8xi32> to vector<8x8xf32>
    %c0_32 = arith.constant 0 : index
    %c0_33 = arith.constant 0 : index
    %81 = vector.load %arg12[%c0_32, %c0_33] : memref<2x8xf32, #tpu.memory_space<vmem>>, vector<1x8xf32>
    %c1 = arith.constant 1 : index
    %c0_34 = arith.constant 0 : index
    %82 = vector.load %arg12[%c1, %c0_34] : memref<2x8xf32, #tpu.memory_space<vmem>>, vector<1x8xf32>
    %c0_35 = arith.constant 0 : index
    %c0_36 = arith.constant 0 : index
    %83 = vector.load %arg11[%c0_35, %c0_36] : memref<8x8xbf16, #tpu.memory_space<vmem>>, vector<8x8xbf16>
    %84 = arith.truncf %80 : vector<8x8xf32> to vector<8x8xbf16>
    %cst_37 = arith.constant dense<0.000000e+00> : vector<8x8xf32>
    %85 = tpu.matmul %83, %84, %cst_37 {dimension_numbers = #tpu.dot_dimension_numbers<[1], [0], [0], [1], [0, 0, 1, 1], [], []>} : vector<8x8xbf16>, vector<8x8xbf16>, vector<8x8xf32> -> vector<8x8xf32>
    %86 = vector.broadcast %81 : vector<1x8xf32> to vector<8x8xf32>
    %87 = arith.addf %85, %86 : vector<8x8xf32>
    %cst_38 = arith.constant 1.000000e+00 : f32
    %88 = vector.broadcast %cst_38 : f32 to vector<8x8xf32>
    %89 = arith.subf %87, %88 : vector<8x8xf32>
    %cst_39 = arith.constant dense<0.000000e+00> : vector<8xf32>
    %90 = vector.multi_reduction <add>, %80, %cst_39 [0] : vector<8x8xf32> to vector<8xf32>
    %91 = vector.shape_cast %90 : vector<8xf32> to vector<1x8xf32>
    %92 = arith.addf %81, %91 : vector<1x8xf32>
    %cst_40 = arith.constant dense<0.000000e+00> : vector<8xf32>
    %93 = vector.multi_reduction <add>, %53, %cst_40 [0] : vector<8x8xf32> to vector<8xf32>
    %94 = vector.shape_cast %93 : vector<8xf32> to vector<1x8xf32>
    %95 = arith.addf %82, %94 : vector<1x8xf32>
    %c0_41 = arith.constant 0 : index
    %c0_42 = arith.constant 0 : index
    %96 = vector.load %arg12[%c0_41, %c0_42] : memref<2x8xf32, #tpu.memory_space<vmem>>, vector<1x8xf32>
    tpu.vector_store %arg12[%c0_41, %c0_42], %92 {strides = array<i32>} : memref<2x8xf32, #tpu.memory_space<vmem>>, vector<1x8xf32>,
    %c1_43 = arith.constant 1 : index
    %c0_44 = arith.constant 0 : index
    %97 = vector.load %arg12[%c1_43, %c0_44] : memref<2x8xf32, #tpu.memory_space<vmem>>, vector<1x8xf32>
    tpu.vector_store %arg12[%c1_43, %c0_44], %95 {strides = array<i32>} : memref<2x8xf32, #tpu.memory_space<vmem>>, vector<1x8xf32>,
    %98 = arith.mulf %89, %80 : vector<8x8xf32>
    %cst_45 = arith.constant dense<0.000000e+00> : vector<8xf32>
    %99 = vector.multi_reduction <add>, %98, %cst_45 [1] : vector<8x8xf32> to vector<8xf32>
    %100 = vector.shape_cast %99 : vector<8xf32> to vector<8x1xf32>
    %cst_46 = arith.constant 8.000000e+00 : f32
    %101 = vector.broadcast %cst_46 : f32 to vector<8x1xf32>
    %102 = arith.cmpf olt, %100, %101 : vector<8x1xf32>
    %103 = arith.extui %102 : vector<8x1xi1> to vector<8x1xi32>
    %104 = arith.sitofp %103 : vector<8x1xi32> to vector<8x1xf32>
    %105 = arith.mulf %70, %104 : vector<8x1xf32>
    %106 = arith.fptosi %100 : vector<8x1xf32> to vector<8x1xi32>
    %c8_i32_47 = arith.constant 8 : i32
    %107 = vector.broadcast %c8_i32_47 : i32 to vector<8x1xi32>
    %108 = arith.muli %76, %107 : vector<8x1xi32>
    %109 = arith.addi %108, %106 : vector<8x1xi32>
    %c0_48 = arith.constant 0 : index
    %c0_49 = arith.constant 0 : index
    %110 = vector.load %arg6[%c0_48, %c0_49] : memref<8x1xi32, #tpu.memory_space<vmem>>, vector<8x1xi32>
    tpu.vector_store %arg6[%c0_48, %c0_49], %109 {strides = array<i32>} : memref<8x1xi32, #tpu.memory_space<vmem>>, vector<8x1xi32>,
    %c0_50 = arith.constant 0 : index
    %c0_51 = arith.constant 0 : index
    %111 = vector.load %arg7[%c0_50, %c0_51] : memref<8x1xf32, #tpu.memory_space<vmem>>, vector<8x1xf32>
    tpu.vector_store %arg7[%c0_50, %c0_51], %105 {strides = array<i32>} : memref<8x1xf32, #tpu.memory_space<vmem>>, vector<8x1xf32>,
    %112 = tpu.iota {dimensions = array<i32: 1>} : vector<8x64xi32>
    %113 = vector.shape_cast %109 : vector<8x1xi32> to vector<8x1xi32>
    %114 = vector.broadcast %113 : vector<8x1xi32> to vector<8x64xi32>
    %115 = vector.shape_cast %105 : vector<8x1xf32> to vector<8x1xf32>
    %116 = vector.broadcast %115 : vector<8x1xf32> to vector<8x64xf32>
    %117 = arith.cmpi eq, %112, %114 : vector<8x64xi32>
    %cst_52 = arith.constant 0.000000e+00 : f32
    %118 = vector.broadcast %cst_52 : f32 to vector<8x64xf32>
    %119 = arith.select %117, %116, %118 : vector<8x64xi1>, vector<8x64xf32>
    %c0_53 = arith.constant 0 : index
    %c0_54 = arith.constant 0 : index
    %120 = vector.load %arg5[%c0_53, %c0_54] : memref<8x64xf32, #tpu.memory_space<vmem>>, vector<8x64xf32>
    tpu.vector_store %arg5[%c0_53, %c0_54], %119 {strides = array<i32>} : memref<8x64xf32, #tpu.memory_space<vmem>>, vector<8x64xf32>,
    %c0_i32_55 = arith.constant 0 : i32
    %121 = arith.cmpi eq, %arg0, %c0_i32_55 : i32
    %122 = arith.extui %121 : i1 to i32
    %c0_i32_56 = arith.constant 0 : i32
    %123 = arith.cmpi ne, %122, %c0_i32_56 : i32
    scf.if %123 {
      %cst_57 = arith.constant 1.250000e-01 : f32
      %124 = vector.broadcast %cst_57 : f32 to vector<1x8xf32>
      %125 = arith.mulf %95, %124 : vector<1x8xf32>
      %cst_58 = arith.constant 1.250000e-01 : f32
      %126 = vector.broadcast %cst_58 : f32 to vector<1x8xf32>
      %127 = arith.mulf %92, %126 : vector<1x8xf32>
      %c0_59 = arith.constant 0 : index
      %c0_60 = arith.constant 0 : index
      %128 = vector.load %arg8[%c0_59, %c0_60] : memref<1x8xf32, #tpu.memory_space<vmem>>, vector<1x8xf32>
      tpu.vector_store %arg8[%c0_59, %c0_60], %92 {strides = array<i32>} : memref<1x8xf32, #tpu.memory_space<vmem>>, vector<1x8xf32>,
      %129 = arith.mulf %125, %127 : vector<1x8xf32>
      %cst_61 = arith.constant dense<0.000000e+00> : vector<1xf32>
      %130 = vector.multi_reduction <add>, %129, %cst_61 [1] : vector<1x8xf32> to vector<1xf32>
      %131 = vector.shape_cast %130 : vector<1xf32> to vector<1x1xf32>
      %cst_62 = arith.constant 3.200000e+01 : f32
      %132 = vector.broadcast %cst_62 : f32 to vector<1x1xf32>
      %133 = arith.mulf %131, %132 : vector<1x1xf32>
      %c0_63 = arith.constant 0 : index
      %c0_64 = arith.constant 0 : index
      %134 = vector.load %arg9[%c0_63, %c0_64] : memref<1x1xf32, #tpu.memory_space<vmem>>, vector<1x1xf32>
      tpu.vector_store %arg9[%c0_63, %c0_64], %133 {strides = array<i32>} : memref<1x1xf32, #tpu.memory_space<vmem>>, vector<1x1xf32>,
      %c0_65 = arith.constant 0 : index
      %c0_66 = arith.constant 0 : index
      %135 = vector.load %arg13[%c0_65, %c0_66] : memref<1x1xf32, #tpu.memory_space<vmem>>, vector<1x1xf32>
      %cst_67 = arith.constant 1.250000e-01 : f32
      %136 = vector.broadcast %cst_67 : f32 to vector<1x1xf32>
      %137 = arith.mulf %135, %136 : vector<1x1xf32>
      %c0_68 = arith.constant 0 : index
      %c0_69 = arith.constant 0 : index
      %138 = vector.load %arg10[%c0_68, %c0_69] : memref<1x1xf32, #tpu.memory_space<vmem>>, vector<1x1xf32>
      tpu.vector_store %arg10[%c0_68, %c0_69], %137 {strides = array<i32>} : memref<1x1xf32, #tpu.memory_space<vmem>>, vector<1x1xf32>,
    } else {
    }
    return
  }
  func.func @transform_0(%arg0: i32) -> (i32, i32) {
    %c0_i32 = arith.constant 0 : i32
    %c0_i32_0 = arith.constant 0 : i32
    return %arg0, %c0_i32 : i32, i32
  }
  func.func @transform_1(%arg0: i32) -> (i32, i32) {
    %c0_i32 = arith.constant 0 : i32
    %c0_i32_0 = arith.constant 0 : i32
    return %arg0, %c0_i32 : i32, i32
  }
  func.func @transform_2(%arg0: i32) -> (i32, i32) {
    %c0_i32 = arith.constant 0 : i32
    %c0_i32_0 = arith.constant 0 : i32
    %c0_i32_1 = arith.constant 0 : i32
    return %c0_i32, %c0_i32_0 : i32, i32
  }
  func.func @transform_3(%arg0: i32) -> (i32, i32) {
    %c0_i32 = arith.constant 0 : i32
    %c0_i32_0 = arith.constant 0 : i32
    %c0_i32_1 = arith.constant 0 : i32
    return %c0_i32, %c0_i32_0 : i32, i32
  }
  func.func @transform_4(%arg0: i32) -> (i32, i32) {
    %c0_i32 = arith.constant 0 : i32
    %c0_i32_0 = arith.constant 0 : i32
    return %arg0, %c0_i32 : i32, i32
  }
  func.func @transform_5(%arg0: i32) -> (i32, i32) {
    %c0_i32 = arith.constant 0 : i32
    %c0_i32_0 = arith.constant 0 : i32
    return %arg0, %c0_i32 : i32, i32
  }
  func.func @transform_6(%arg0: i32) -> (i32, i32) {
    %c0_i32 = arith.constant 0 : i32
    %c0_i32_0 = arith.constant 0 : i32
    return %arg0, %c0_i32 : i32, i32
  }
  func.func @transform_7(%arg0: i32) -> (i32, i32) {
    %c0_i32 = arith.constant 0 : i32
    %c0_i32_0 = arith.constant 0 : i32
    %c0_i32_1 = arith.constant 0 : i32
    return %c0_i32, %c0_i32_0 : i32, i32
  }
  func.func @transform_8(%arg0: i32) -> (i32, i32) {
    %c0_i32 = arith.constant 0 : i32
    %c0_i32_0 = arith.constant 0 : i32
    %c0_i32_1 = arith.constant 0 : i32
    return %c0_i32, %c0_i32_0 : i32, i32
  }
  func.func @transform_9(%arg0: i32) -> (i32, i32) {
    %c0_i32 = arith.constant 0 : i32
    %c0_i32_0 = arith.constant 0 : i32
    %c0_i32_1 = arith.constant 0 : i32
    return %c0_i32, %c0_i32_0 : i32, i32
  }
}

</mosaic_0001>

<bundles_post_ra>
// kernel: tpu_custom_call.1
= control target key start
LH: loop header
LB: loop body
LE: loop exit
PB: predicated region body
PF: predicated region fallthrough
CT: control target
= control target key end

     0   :  { %15 = vsyncpa [#allocation6], 0  ;;  %s640_s0 = inlined_call_operand.vmem [shape: f32[8,32], index: 0, kind: input, shape index: {}]   ;;  %s641_s1 = inlined_call_operand.vmem [shape: f32[8,32], index: 1, kind: input, shape index: {}]   ;;  %s642_s2 = inlined_call_operand.vmem [shape: f32[32,8], index: 2, kind: input, shape index: {}]   ;;  %s643_s3 = inlined_call_operand.vmem [shape: f32[32,8], index: 3, kind: input, shape index: {}]   ;;  %s644_s4 = inlined_call_operand.hbm [shape: f32[8,64], index: 4, kind: output, shape index: {0}]   ;;  %s645_s5 = inlined_call_operand.vmem [shape: s32[8,1], index: 5, kind: output, shape index: {1}]   ;;  %s646_s6 = inlined_call_operand.vmem [shape: f32[8,1], index: 6, kind: output, shape index: {2}]   ;;  %s647_s7 = inlined_call_operand.hbm [shape: f32[1,8], index: 7, kind: output, shape index: {3}]   ;;  %s648_s8 = inlined_call_operand.hbm [shape: f32[1,1], index: 8, kind: output, shape index: {4}]   ;;  %s649_s9 = inlined_call_operand.hbm [shape: f32[1,1], index: 9, kind: output, shape index: {5}]  }
   0x1   :  { %16 = vsyncpa [#allocation8], 0  ;;  %v51_v0 = vld [vmem:[%s642_s2 + $0x10] sm:$0xff]  ;;  %v52_v1 = vld [vmem:[%s642_s2 + $0x18] sm:$0xff] }
   0x2   :  { %v49_v2 = vld [vmem:[%s642_s2] sm:$0xff]  ;;  %v54_v3 = vpack.c.bf16 %v52_v1, %v51_v0  ;;  %v50_v4 = vld [vmem:[%s642_s2 + $0x8] sm:$0xff] }
   0x3   :  { %17 = vsyncpa [#allocation11], 0  ;;  %v53_v5 = vpack.c.bf16 %v50_v4, %v49_v2  ;;  %v47_v6 = vld [vmem:[%s640_s0] sm:$0xff]  ;;  %vm55_vm0 = vcmask 261120   ;;  %v35_v8 = vlaneseq  ;;  %vm74_vm2 = vcmask 64512   ;;  %v123_v30 = vld [vmem:[%s643_s3 + $0x10] sm:$0xff] }
   0x4   :  { %65 = vmatpush.bf16.msra.mxu0 %v54_v3  ;;  %v48_v7 = vpack.c.bf16 %v47_v6, %v47_v6  ;;  %v124_v31 = vld [vmem:[%s643_s3 + $0x18] sm:$0xff]  ;;  %v121_v32 = vld [vmem:[%s643_s3] sm:$0xff]  ;;  %v122_v34 = vld [vmem:[%s643_s3 + $0x8] sm:$0xff]  ;;  %vm31_vm10 = vcmask 58368   ;;  %v484_v61 = vmov 0.0   ;;  %s310_s27 = sshll.u32 %s647_s7, 4  ;;  %s311_s27 = int_to_ptr.hbm [resolvable:$true] %s310_s27 }
   0x5   :  { %v556_v9 = vand.u32 127, %v35_v8  ;;  %v126_v33 = vpack.c.bf16 %v124_v31, %v123_v30  ;;  %v125_v35 = vpack.c.bf16 %v122_v34, %v121_v32  ;;  %v119_v36 = vld [vmem:[%s641_s1] sm:$0xff]  ;;  %32 = vst.msk [vmem:[#allocation3] sm:$0x3] %vm31_vm10, %v484_v61  ;;  %s485_s28 = smov [#allocation7]   ;;  %s486_s30 = smov [#allocation9]  }
   0x6   :  { %v120_v37 = vpack.c.bf16 %v119_v36, %v119_v36  ;;  %s308_s29 = sshll.u32 %s485_s28, 4  ;;  %s319_s10 = sshll.u32 %s486_s30, 4  ;;  %vm266_vm10 = vcmask 7168   ;;  %s309_s29 = int_to_ptr.vmem [resolvable:$true] %s308_s29  ;;  %s320_s10 = int_to_ptr.vmem [resolvable:$true] %s319_s10 }
   0x7   :  { %vm72_vm1 = vcmp.eq.s32.totalorder %v556_v9, 0  ;;  %136 = vmatpush.bf16.msra.mxu1 %v126_v33  ;;  %s321_s13 = sshll.u32 %s648_s8, 4  ;;  %s332_s15 = sshll.u32 %s649_s9, 4  ;;  %s322_s13 = int_to_ptr.hbm [resolvable:$true] %s321_s13  ;;  %s333_s15 = int_to_ptr.hbm [resolvable:$true] %s332_s15 }
   0x8   :  { %66 = vmatpush.bf16.msra.mxu0 %v53_v5  ;;  %s487_s16 = smov [#allocation10]   ;;  %s488_s18 = smov [#allocation5]  }
   0x9   :  { %s330_s17 = sshll.u32 %s487_s16, 4  ;;  %s293_s0 = sshll.u32 %s488_s18, 4  ;;  %s331_s17 = int_to_ptr.vmem [resolvable:$true] %s330_s17  ;;  %s294_s0 = int_to_ptr.vmem [resolvable:$true] %s293_s0 }
   0xa   :  { %s295_s20 = sshll.u32 %s644_s4, 4  ;;  %s296_s20 = int_to_ptr.hbm [resolvable:$true] %s295_s20 }
   0xb   :  { %360 = vmatmul.msk.bf16.vlgmr.msra.gmra.mxu0 %vm55_vm0, %v48_v7  ;;  %137 = vmatpush.bf16.msra.mxu1 %v125_v35 }
   0xe   :  { %361 = vmatmul.msk.bf16.vlgmr.msra.gmra.mxu1 %vm55_vm0, %v120_v37  ;;  %vm252_vm0 = vcmask 57344  }
  0x88   :  { %v68_v10 = vpop.f32.mrf.mxu0 }
  0x89   :  { %v73_v11 = vsel %vm72_vm1, -1e+09, %v68_v10  ;;  %vm33_vm1 = vcmask 0  }
  0x8a   :  { %v75_v12 = vsel %vm74_vm2, %v73_v11, -inf  ;;  %34 = vst.msk [vmem:[#allocation4] sm:$0x1] %vm33_vm1, %v484_v61 }
  0x8b   :  { %76 = vmax.xlane.f32.xlu0 %v75_v12  ;;  %v139_v43 = vpop.f32.mrf.mxu1 }
  0x90   :  { %v70_v13 = vpop.f32.mrf.mxu0 }
  0x93   :  { %v141_v45 = vpop.f32.mrf.mxu1 }
  0xfe   :  { %v77_v14 = vpop.xlane.xlu0 %76 }
  0xff   :  { %vm78_vm3 = vcmp.eq.f32.partialorder %v73_v11, %v77_v14 }
 0x100   :  { %v79_v15 = vsel %vm78_vm3, %v556_v9, 8 }
 0x101   :  { %v80_v16 = vsel %vm74_vm2, %v79_v15, 2147483647 }
 0x102   :  { %v82_v17 = vshra.s32 %v80_v16, 16  ;;  %v81_v19 = vand.u32 65535, %v80_v16 }
 0x104   :  { %v84_v18 = vcvt.s32.f32 %v82_v17  ;;  %v83_v21 = vcvt.s32.f32 %v81_v19 }
 0x106   :  { %85 = vmin.xlane.f32.xlu0 %v84_v18 }
 0x179   :  { %v86_v20 = vpop.xlane.xlu0 %85 }
 0x17a   :  { %vm87_vm4 = vcmp.eq.f32.partialorder %v84_v18, %v86_v20  ;;  %v92_v23 = vcvt.f32.s32 %v86_v20 }
 0x17b   :  { %v88_v22 = vsel %vm87_vm4, %v83_v21, inf }
 0x17c   :  { %89 = vmin.xlane.f32.xlu1 %v88_v22  ;;  %v93_v25 = vshll.u32 %v92_v23, 16  ;;  %v211_v22 = vld [vmem:[#allocation3 + $0x1] sm:$0x1] }
 0x1ef   :  { %v90_v24 = vpop.xlane.xlu1 %89 }
 0x1f0   :  { %v91_v26 = vcvt.f32.s32 %v90_v24 }
 0x1f2   :  { %v94_v27 = vadd.s32 %v93_v25, %v91_v26 }
 0x1f4   :  { %vm95_vm5 = vcmp.eq.s32.totalorder %v556_v9, %v94_v27 }
 0x1f5   :  { %v96_v28 = vsel %vm95_vm5, -1e+30, %v73_v11 }
 0x1f6   :  { %v97_v29 = vsel %vm74_vm2, %v96_v28, -inf }
 0x1f7   :  { %98 = vmax.xlane.f32.xlu1 %v97_v29 }
 0x26a   :  { %v99_v38 = vpop.xlane.xlu1 %98 }
 0x26b   :  { %vm100_vm6 = vcmp.eq.f32.partialorder %v96_v28, %v99_v38 }
 0x26c   :  { %v101_v39 = vsel %vm100_vm6, %v556_v9, 8  ;;  %vm43_vm6 = vcmask 60416  }
 0x26d   :  { %v102_v40 = vsel %vm74_vm2, %v101_v39, 2147483647  ;;  %v177_v39 = vld [vmem:[#allocation4] sm:$0x1] }
 0x26e   :  { %v104_v41 = vshra.s32 %v102_v40, 16  ;;  %v103_v44 = vand.u32 65535, %v102_v40 }
 0x270   :  { %v106_v42 = vcvt.s32.f32 %v104_v41  ;;  %v105_v47 = vcvt.s32.f32 %v103_v44 }
 0x272   :  { %107 = vmin.xlane.f32.xlu2 %v106_v42 }
 0x2e5   :  { %v108_v46 = vpop.xlane.xlu2 %107 }
 0x2e6   :  { %vm109_vm7 = vcmp.eq.f32.partialorder %v106_v42, %v108_v46  ;;  %v114_v49 = vcvt.f32.s32 %v108_v46 }
 0x2e7   :  { %v110_v48 = vsel %vm109_vm7, %v105_v47, inf }
 0x2e8   :  { %111 = vmin.xlane.f32.xlu2 %v110_v48  ;;  %v115_v51 = vshll.u32 %v114_v49, 16  ;;  %v36_v48 = vshrl.u32 %v35_v8, 7 }
 0x35b   :  { %v112_v50 = vpop.xlane.xlu2 %111 }
 0x35c   :  { %v113_v52 = vcvt.f32.s32 %v112_v50 }
 0x35e   :  { %v116_v53 = vadd.s32 %v115_v51, %v113_v52 }
 0x360   :  { %vm117_vm8 = vcmp.eq.s32.totalorder %v556_v9, %v116_v53 }
 0x361   :  { %vm118_vm9 = vmor %vm95_vm5, %vm117_vm8  ;;  %vm39_vm5 = vcmp.le.s32.totalorder %v556_v9, %v36_v48  ;;  %vm218_vm8 = vcmask 1043456  }
 0x362   :  { %v143_v54 = vsel %vm118_vm9, %v139_v43, -1e+09  ;;  %v359_v49 = vsel %vm39_vm5, 1.0, %v484_v61 }
 0x363   :  { %v144_v55 = vsel %vm74_vm2, %v143_v54, -inf  ;;  %v42_v50 = vpack.c.bf16 %v359_v49, %v359_v49 }
 0x364   :  { %145 = vmax.xlane.f32.xlu0 %v144_v55 }
 0x365   :  { %44 = vst.msk [vmem:[#allocation2] sm:$0xf] %vm43_vm6, %v42_v50 }
 0x3d7   :  { %v146_v56 = vpop.xlane.xlu0 %145 }
 0x3d8   :  { %v147_v57 = vsub.f32 %v143_v54, %v146_v56 }
 0x3da   :  { %v148_v58 = vmul.f32 1.442695, %v147_v57 }
 0x3dc   :  { %376 = vpow2.f32 %v148_v58 }
 0x3e2   :  { %v377_v59 = vpop.eup %376 }
 0x3e3   :  { %v150_v60 = vsel %vm74_vm2, %v377_v59, 0.0 }
 0x3e4   :  { %151 = vadd.xlane.f32.xlu1 %v150_v60 }
 0x457   :  { %v152_v62 = vpop.xlane.xlu1 %151 }
 0x458   :  { %378 = vrcp.f32 %v152_v62  ;;  %v164_v2 = vand.u32 2147483648, %v152_v62  ;;  %v162_v4 = vand.u32 2147483647, %v152_v62  ;;  %vm158_vm12 = vweird.f32 %v152_v62 }
 0x45a   :  { %v165_v6 = vor.u32 1.1754944e-38, %v164_v2  ;;  %vm163_vm14 = vcmp.eq.f32.partialorder %v162_v4, 8.507059e+37  ;;  %v210_v2 = vld [vmem:[#allocation3] sm:$0x1] }
 0x45e   :  { %v379_v63 = vpop.eup %378 }
 0x45f   :  { %v154_v0 = vmul.f32 %v379_v63, %v152_v62  ;;  %vm159_vm11 = vweird.f32 %v379_v63  ;;  %v212_v62 = vld [vmem:[#allocation2] sm:$0xf] }
 0x460   :  { %vm160_vm13 = vmor %vm158_vm12, %vm159_vm11  ;;  %vm271_vm11 = vcmask 523264  }
 0x461   :  { %v155_v1 = vsub.f32 1.0, %v154_v0 }
 0x463   :  { %v156_v3 = vmul.f32 %v379_v63, %v155_v1 }
 0x465   :  { %v157_v5 = vadd.f32 %v379_v63, %v156_v3 }
 0x467   :  { %v161_v7 = vsel %vm160_vm13, %v379_v63, %v157_v5 }
 0x468   :  { %v166_v10 = vsel %vm163_vm14, %v165_v6, %v161_v7 }
 0x469   :  { %v167_v11 = vmul.f32 %v377_v59, %v166_v10 }
 0x46b   :  { %v187_v12 = vsel %vm74_vm2, %v167_v11, -inf  ;;  %vm168_vm15 = vcmp.gt.f32.partialorder %v167_v11, 0.0  ;;  %v244_v13 = vsel %vm74_vm2, %v167_v11, 0.0 }
 0x46c   :  { %188 = vmax.xlane.f32.xlu2 %v187_v12  ;;  %v169_v14 = vsel %vm168_vm15, %v167_v11, 1.0  ;;  %v245_v15 = vrot.slane %v244_v13, 4 }
 0x46d   :  { %380 = vlog2.f32 %v169_v14 }
 0x46e   :  { %v246_v16 = vadd.f32 %v245_v15, %v244_v13 }
 0x470   :  { %v247_v17 = vrot.slane %v246_v16, 2 }
 0x472   :  { %v248_v18 = vadd.f32 %v247_v17, %v246_v16 }
 0x473   :  { %v381_v19 = vpop.eup %380 }
 0x474   :  { %v171_v20 = vmul.f32 0.6931472, %v381_v19  ;;  %v249_v21 = vrot.slane %v248_v18, 1 }
 0x476   :  { %v172_v23 = vmul.f32 %v171_v20, %v167_v11  ;;  %v250_v24 = vadd.f32 %v249_v21, %v248_v18 }
 0x478   :  { %v173_v25 = vsel %vm74_vm2, %v172_v23, 0.0  ;;  %v251_v26 = vadd.f32 %v250_v24, %v211_v22 }
 0x479   :  { %174 = vadd.xlane.f32.xlu2 %v173_v25 }
 0x47a   :  { %254 = vst.msk [vmem:[#allocation3 + $0x1] sm:$0x1] %vm252_vm0, %v251_v26  ;;  %v276_v5 = vmul.f32 0.125, %v251_v26 }
 0x4df   :  { %v596_v27 = vpop.xlane.xlu2 %188 }
 0x4e0   :  { %vm190_vm3 = vcmp.eq.f32.partialorder %v167_v11, %v596_v27  ;;  %v214_v11 = vperm.slane %v210_v2, 0 }
 0x4e1   :  { %v191_v28 = vsel %vm190_vm3, %v556_v9, 8 }
 0x4e2   :  { %v192_v29 = vsel %vm74_vm2, %v191_v28, 2147483647 }
 0x4e3   :  { %v194_v30 = vshra.s32 %v192_v29, 16  ;;  %v193_v44 = vand.u32 65535, %v192_v29 }
 0x4e5   :  { %v196_v31 = vcvt.s32.f32 %v194_v30  ;;  %v195_v46 = vcvt.s32.f32 %v193_v44 }
 0x4e7   :  { %197 = vmin.xlane.f32.xlu0 %v196_v31 }
 0x4ec   :  { %v175_v32 = vpop.xlane.xlu2 %174 }
 0x4ed   :  { %v176_v33 = vsub.f32 0.0, %v175_v32 }
 0x4ef   :  { %v178_v34 = vrot.slane %v176_v33, 4 }
 0x4f1   :  { %v179_v35 = vadd.f32 %v178_v34, %v176_v33 }
 0x4f3   :  { %v180_v36 = vrot.slane %v179_v35, 2 }
 0x4f5   :  { %v181_v37 = vadd.f32 %v180_v36, %v179_v35 }
 0x4f7   :  { %v182_v38 = vrot.slane %v181_v37, 1 }
 0x4f9   :  { %v183_v40 = vadd.f32 %v182_v38, %v181_v37 }
 0x4fb   :  { %v184_v41 = vadd.f32 %v183_v40, %v177_v39 }
 0x4fd   :  { %186 = vst.msk [vmem:[#allocation4] sm:$0x1] %vm33_vm1, %v184_v41 }
 0x504   :  { %v285_v42 = vld [vmem:[#allocation4] sm:$0x1] }
 0x505   :  { %v286_v43 = vmul.f32 0.125, %v285_v42 }
 0x507   :  { %287 = vst.msk [vmem:[#allocation10] sm:$0x1] %vm33_vm1, %v286_v43 }
 0x508   :  { %335 = dma.vmem_to_hbm [thread:$0]  %s331_s17, 16, %s333_s15, [#allocation11]  }
 0x55a   :  { %v198_v45 = vpop.xlane.xlu0 %197 }
 0x55b   :  { %vm199_vm4 = vcmp.eq.f32.partialorder %v196_v31, %v198_v45  ;;  %v204_v51 = vcvt.f32.s32 %v198_v45 }
 0x55c   :  { %v200_v47 = vsel %vm199_vm4, %v195_v46, inf }
 0x55d   :  { %201 = vmin.xlane.f32.xlu1 %v200_v47  ;;  %v205_v53 = vshll.u32 %v204_v51, 16 }
 0x5d0   :  { %v202_v52 = vpop.xlane.xlu1 %201 }
 0x5d1   :  { %v203_v54 = vcvt.f32.s32 %v202_v52 }
 0x5d3   :  { %v606_v55 = vadd.s32 %v205_v53, %v203_v54 }
 0x5d5   :  { %vm207_vm7 = vcmp.eq.s32.totalorder %v556_v9, %v606_v55  ;;  %v264_v26 = vmul.u32 8, %v606_v55 }
 0x5d6   :  { %v362_v56 = vsel %vm207_vm7, 1.0, %v484_v61 }
 0x5d7   :  { %v213_v8 = vpack.c.bf16 %v362_v56, %v362_v56  ;;  %v236_v57 = vsel %vm74_vm2, %v362_v56, 0.0 }
 0x5d8   :  { %v237_v58 = vrot.slane %v236_v57, 4 }
 0x5d9   :  { %v220_v59 = vsel %vm218_vm8, %v213_v8, 0 }
 0x5da   :  { %229 = vmatpush.bf16.msra.mxu2 %v220_v59  ;;  %v238_v60 = vadd.f32 %v237_v58, %v236_v57 }
 0x5dc   :  { %v239_v63 = vrot.slane %v238_v60, 2 }
 0x5dd   :  { %363 = vmatmul.msk.bf16.vlgmr.msra.gmra.mxu2 %vm74_vm2, %v212_v62 }
 0x5de   :  { %v240_v0 = vadd.f32 %v239_v63, %v238_v60 }
 0x5e0   :  { %v241_v1 = vrot.slane %v240_v0, 1 }
 0x5e2   :  { %v242_v3 = vadd.f32 %v241_v1, %v240_v0 }
 0x5e4   :  { %v243_v4 = vadd.f32 %v242_v3, %v210_v2 }
 0x5e6   :  { %v277_v6 = vmul.f32 0.125, %v243_v4  ;;  %253 = vst.msk [vmem:[#allocation3] sm:$0x1] %vm252_vm0, %v243_v4 }
 0x5e7   :  { %278 = vst.msk [vmem:[#allocation7] sm:$0x1] %vm252_vm0, %v243_v4 }
 0x5e8   :  { %v279_v7 = vmul.f32 %v277_v6, %v276_v5  ;;  %313 = dma.vmem_to_hbm [thread:$0]  %s309_s29, 16, %s311_s27, [#allocation8]  }
 0x5ea   :  { %v280_v10 = vsel %vm252_vm0, %v279_v7, 0.0 }
 0x5eb   :  { %281 = vadd.xlane.f32.xlu1 %v280_v10 }
 0x65e   :  { %v282_v12 = vpop.xlane.xlu1 %281 }
 0x65f   :  { %v283_v13 = vmul.f32 32.0, %v282_v12 }
 0x660   :  { %v231_v14 = vpop.f32.mrf.mxu2 }
 0x661   :  { %284 = vst.msk [vmem:[#allocation9] sm:$0x1] %vm33_vm1, %v283_v13  ;;  %v232_v15 = vadd.f32 %v231_v14, %v214_v11 }
 0x662   :  { %324 = dma.vmem_to_hbm [thread:$0]  %s320_s10, 16, %s322_s13, [#allocation8]  }
 0x663   :  { %v364_v16 = vadd.f32 -1.0, %v232_v15 }
 0x665   :  { %v255_v17 = vmul.f32 %v364_v16, %v362_v56 }
 0x667   :  { %v256_v18 = vsel %vm74_vm2, %v255_v17, 0.0 }
 0x668   :  { %v233_v19 = vpop.f32.mrf.mxu2  ;;  %257 = vadd.xlane.f32.xlu0 %v256_v18 }
 0x6db   :  { %v258_v20 = vpop.xlane.xlu0 %257 }
 0x6dc   :  { %vm259_vm2 = vcmp.lt.f32.partialorder %v258_v20, 8.0  ;;  %vm366_vm9 = vcmp.lt.s32.totalorder %v258_v20, 0  ;;  %v367_v21 = vceil.f32 %v258_v20  ;;  %v368_v22 = vfloor.f32 %v258_v20 }
 0x6dd   :  { %v365_v23 = vsel %vm259_vm2, 1.0, %v484_v61 }
 0x6de   :  { %v369_v24 = vsel %vm366_vm9, %v367_v21, %v368_v22  ;;  %v262_v25 = vmul.f32 %v365_v23, %v596_v27 }
 0x6df   :  { %v370_v28 = vcvt.f32.s32 %v369_v24 }
 0x6e0   :  { %268 = vst.msk [vmem:[%s646_s6] sm:$0xff] %vm266_vm10, %v262_v25 }
 0x6e1   :  { %v265_v29 = vadd.s32 %v370_v28, %v264_v26 }
 0x6e3   :  { %267 = vst.msk [vmem:[%s645_s5] sm:$0xff] %vm266_vm10, %v265_v29  ;;  %vm269_vm12 = vcmp.eq.s32.totalorder %v556_v9, %v265_v29 }
 0x6e4   :  { %v270_v61 = vsel %vm269_vm12, %v262_v25, 0.0 }
 0x6e5   :  { %272 = vst.msk [vmem:[#allocation5] sm:$0xff] %vm271_vm11, %v270_v61 }
 0x6e6   :  { %298 = dma.vmem_to_hbm [thread:$0]  %s294_s0, 128, %s296_s20, [#allocation6]  }
 0x6e7   :  { %478 = dma.done.wait [#allocation6], 128  }
 0x6e8   :  { %479 = vsyncadd [#allocation6], 4294967168 }
 0x6e9   :  { %480 = dma.done.wait [#allocation8], 32  }
 0x6ea   :  { %481 = vsyncadd [#allocation8], 4294967264 }
 0x6eb   :  { %482 = dma.done.wait [#allocation11], 16  }
 0x6ec   :  { %483 = vsyncadd [#allocation11], 4294967280 }
 0x6ed   :  { %356 = vsyncpa [#allocation6], 1 }
 0x6ee   :  { %357 = vsyncpa [#allocation8], 1 }
 0x6ef   :  { %358 = vsyncpa [#allocation11], 1 }

</bundles_post_ra>
